<compile_context>
chip_gen: v7x
topology: tpu7x:2x2x1
jax: 0.10.0
libtpu: 0.0.40
codegen_flags: <defaults>
</compile_context>

<pallas_src>
import jax
import jax.numpy as jnp
from jax.experimental import pallas as pl
from jax.experimental.pallas import tpu as pltpu


def actor_kernel(x_ref, w1_ref, b1_ref, w2_ref, b2_ref, w3_ref, b3_ref, o_ref):
    x = x_ref[...]                                           # (4, blk) f32

    def layer(w_ref, b_ref, h):
        # h: (in, blk); w: (out, in); b: (out, 1)  ->  (out, blk)
        w = w_ref[...]
        out_dim, in_dim = w.shape
        blk = h.shape[1]
        acc = jnp.broadcast_to(b_ref[...], (out_dim, blk))   # bias, lane-broadcast
        # Unrolled broadcast-FMA on the VPU (no MXU fill/drain for K<=16).
        for k in range(in_dim):
            acc = acc + w[:, k:k + 1] * h[k:k + 1, :]
        return acc

    h1 = jnp.maximum(layer(w1_ref, b1_ref, x), 0.0)          # (8,  blk)
    h2 = jnp.maximum(layer(w2_ref, b2_ref, h1), 0.0)         # (16, blk)
    z = layer(w3_ref, b3_ref, h2)                            # (1,  blk)

    # sigmoid: exp on the EUP, reciprocal via pl.reciprocal (exact, so the
    # result matches jax.nn.sigmoid to float32 precision).
    o_ref[...] = pl.reciprocal(1.0 + jnp.exp(-z)).astype(o_ref.dtype)


def actor_forward(x, params, *, block_b=512):
    """x: (B, 4) float32 (PyTorch layout). Returns (B, 1) float32."""
    w1, b1, w2, b2, w3, b3 = params
    B = x.shape[0]

    # Lane block: multiple of 128, capped at block_b, covering small batches too.
    blk = int(min(block_b, max(128, pl.next_power_of_2(B))))
    n_blocks = int(pl.cdiv(B, blk))
    b_pad = n_blocks * blk

    # Lane-dense, zero-padded input slab (4, b_pad); pad columns are discarded.
    xt = jnp.zeros((4, b_pad), jnp.float32).at[:, :B].set(x.T.astype(jnp.float32))

    def resident(shape):
        # Weights/biases: full-array block, same block every grid step (no re-DMA).
        return pl.BlockSpec(shape, lambda i: (0, 0))

    out = pl.pallas_call(
        actor_kernel,
        out_shape=jax.ShapeDtypeStruct((1, b_pad), jnp.float32),
        grid_spec=pl.GridSpec(
            grid=(n_blocks,),
            in_specs=[
                pl.BlockSpec((4, blk), lambda i: (0, i)),     # x: tiled along lanes
                resident(w1.shape), resident(b1.shape),
                resident(w2.shape), resident(b2.shape),
                resident(w3.shape), resident(b3.shape),
            ],
            out_specs=pl.BlockSpec((1, blk), lambda i: (0, i)),
        ),
        compiler_params=pltpu.CompilerParams(
            dimension_semantics=("parallel",),                # megacore on v7x
        ),
    )(xt, w1, b1, w2, b2, w3, b3)

    return out[:, :B].T                                       # back to (B, 1)


def init_params(key):
    # Mimics nn.Linear's uniform(-1/sqrt(fan_in), 1/sqrt(fan_in)) init,
    # stored in PyTorch layout: w (out, in), b (out, 1).
    def linear(key, fan_in, fan_out):
        kw, kb = jax.random.split(key)
        bound = 1.0 / jnp.sqrt(float(fan_in))
        w = jax.random.uniform(kw, (fan_out, fan_in), jnp.float32, -bound, bound)
        b = jax.random.uniform(kb, (fan_out, 1), jnp.float32, -bound, bound)
        return w, b

    k1, k2, k3 = jax.random.split(key, 3)
    w1, b1 = linear(k1, 4, 8)
    w2, b2 = linear(k2, 8, 16)
    w3, b3 = linear(k3, 16, 1)
    return (w1, b1, w2, b2, w3, b3)


def actor_ref(x, params):
    w1, b1, w2, b2, w3, b3 = params
    h1 = jnp.maximum(x @ w1.T + b1[:, 0], 0.0)
    h2 = jnp.maximum(h1 @ w2.T + b2[:, 0], 0.0)
    return jax.nn.sigmoid(h2 @ w3.T + b3[:, 0])


if __name__ == "__main__":
    key = jax.random.PRNGKey(0)
    kx, kp, kx2 = jax.random.split(key, 3)
    params = init_params(kp)

    # Small-batch check (matches the tiny module spec): B=8 -> one 128-lane block.
    batch = 8
    x = jax.random.normal(kx, (batch, 4), jnp.float32)
    out = jax.block_until_ready(actor_forward(x, params))
    ref = actor_ref(x, params)
    assert out.shape == (batch, 1)
    assert jnp.allclose(out, ref, atol=1e-5, rtol=1e-5)

    # Larger batch exercises the multi-block "parallel" grid + lane padding.
    big = 1000
    xb = jax.random.normal(kx2, (big, 4), jnp.float32)
    outb = jax.block_until_ready(actor_forward(xb, params))
    refb = actor_ref(xb, params)
    assert outb.shape == (big, 1)
    assert jnp.allclose(outb, refb, atol=1e-5, rtol=1e-5)

    print("KERNEL_OK")
</pallas_src>

<mosaic_0001>
module attributes {stable_mosaic.version = 11 : i64} {
  func.func @actor_kernel(%arg0: i32, %arg1: memref<4x128xf32, #tpu.memory_space<vmem>>, %arg2: memref<8x4xf32, #tpu.memory_space<vmem>>, %arg3: memref<8x1xf32, #tpu.memory_space<vmem>>, %arg4: memref<16x8xf32, #tpu.memory_space<vmem>>, %arg5: memref<16x1xf32, #tpu.memory_space<vmem>>, %arg6: memref<1x16xf32, #tpu.memory_space<vmem>>, %arg7: memref<1x1xf32, #tpu.memory_space<vmem>>, %arg8: memref<1x128xf32, #tpu.memory_space<vmem>>) attributes {dimension_semantics = [#tpu.dimension_semantics<parallel>], iteration_bounds = array<i64: 1>, scalar_prefetch = 0 : i64, scratch_operands = 0 : i64, tpu.core_type = #tpu.core_type<tc>, window_params = [{transform_indices = @transform_0, window_bounds = array<i64: 4, 128>}, {pipeline_mode = #tpu.pipeline_mode<synchronous>, transform_indices = @transform_1, window_bounds = array<i64: 8, 4>}, {pipeline_mode = #tpu.pipeline_mode<synchronous>, transform_indices = @transform_2, window_bounds = array<i64: 8, 1>}, {pipeline_mode = #tpu.pipeline_mode<synchronous>, transform_indices = @transform_3, window_bounds = array<i64: 16, 8>}, {pipeline_mode = #tpu.pipeline_mode<synchronous>, transform_indices = @transform_4, window_bounds = array<i64: 16, 1>}, {pipeline_mode = #tpu.pipeline_mode<synchronous>, transform_indices = @transform_5, window_bounds = array<i64: 1, 16>}, {pipeline_mode = #tpu.pipeline_mode<synchronous>, transform_indices = @transform_6, window_bounds = array<i64: 1, 1>}, {transform_indices = @transform_7, window_bounds = array<i64: 1, 128>}]} {
    %c0 = arith.constant 0 : index
    %c0_0 = arith.constant 0 : index
    %0 = vector.load %arg1[%c0, %c0_0] : memref<4x128xf32, #tpu.memory_space<vmem>>, vector<4x128xf32>
    %c0_1 = arith.constant 0 : index
    %c0_2 = arith.constant 0 : index
    %1 = vector.load %arg2[%c0_1, %c0_2] : memref<8x4xf32, #tpu.memory_space<vmem>>, vector<8x4xf32>
    %c0_3 = arith.constant 0 : index
    %c0_4 = arith.constant 0 : index
    %2 = vector.load %arg3[%c0_3, %c0_4] : memref<8x1xf32, #tpu.memory_space<vmem>>, vector<8x1xf32>
    %3 = vector.shape_cast %2 : vector<8x1xf32> to vector<8x1xf32>
    %4 = vector.broadcast %3 : vector<8x1xf32> to vector<8x128xf32>
    %5 = vector.extract_strided_slice %1 {offsets = [0, 0], sizes = [8, 1], strides = [1, 1]} : vector<8x4xf32> to vector<8x1xf32>
    %6 = vector.extract_strided_slice %0 {offsets = [0, 0], sizes = [1, 128], strides = [1, 1]} : vector<4x128xf32> to vector<1x128xf32>
    %7 = vector.broadcast %5 : vector<8x1xf32> to vector<8x128xf32>
    %8 = vector.broadcast %6 : vector<1x128xf32> to vector<8x128xf32>
    %9 = arith.mulf %7, %8 : vector<8x128xf32>
    %10 = arith.addf %4, %9 : vector<8x128xf32>
    %11 = vector.extract_strided_slice %1 {offsets = [0, 1], sizes = [8, 1], strides = [1, 1]} : vector<8x4xf32> to vector<8x1xf32>
    %12 = vector.extract_strided_slice %0 {offsets = [1, 0], sizes = [1, 128], strides = [1, 1]} : vector<4x128xf32> to vector<1x128xf32>
    %13 = vector.broadcast %11 : vector<8x1xf32> to vector<8x128xf32>
    %14 = vector.broadcast %12 : vector<1x128xf32> to vector<8x128xf32>
    %15 = arith.mulf %13, %14 : vector<8x128xf32>
    %16 = arith.addf %10, %15 : vector<8x128xf32>
    %17 = vector.extract_strided_slice %1 {offsets = [0, 2], sizes = [8, 1], strides = [1, 1]} : vector<8x4xf32> to vector<8x1xf32>
    %18 = vector.extract_strided_slice %0 {offsets = [2, 0], sizes = [1, 128], strides = [1, 1]} : vector<4x128xf32> to vector<1x128xf32>
    %19 = vector.broadcast %17 : vector<8x1xf32> to vector<8x128xf32>
    %20 = vector.broadcast %18 : vector<1x128xf32> to vector<8x128xf32>
    %21 = arith.mulf %19, %20 : vector<8x128xf32>
    %22 = arith.addf %16, %21 : vector<8x128xf32>
    %23 = vector.extract_strided_slice %1 {offsets = [0, 3], sizes = [8, 1], strides = [1, 1]} : vector<8x4xf32> to vector<8x1xf32>
    %24 = vector.extract_strided_slice %0 {offsets = [3, 0], sizes = [1, 128], strides = [1, 1]} : vector<4x128xf32> to vector<1x128xf32>
    %25 = vector.broadcast %23 : vector<8x1xf32> to vector<8x128xf32>
    %26 = vector.broadcast %24 : vector<1x128xf32> to vector<8x128xf32>
    %27 = arith.mulf %25, %26 : vector<8x128xf32>
    %28 = arith.addf %22, %27 : vector<8x128xf32>
    %cst = arith.constant 0.000000e+00 : f32
    %29 = vector.broadcast %cst : f32 to vector<8x128xf32>
    %30 = arith.maximumf %28, %29 : vector<8x128xf32>
    %c0_5 = arith.constant 0 : index
    %c0_6 = arith.constant 0 : index
    %31 = vector.load %arg4[%c0_5, %c0_6] : memref<16x8xf32, #tpu.memory_space<vmem>>, vector<16x8xf32>
    %c0_7 = arith.constant 0 : index
    %c0_8 = arith.constant 0 : index
    %32 = vector.load %arg5[%c0_7, %c0_8] : memref<16x1xf32, #tpu.memory_space<vmem>>, vector<16x1xf32>
    %33 = vector.shape_cast %32 : vector<16x1xf32> to vector<16x1xf32>
    %34 = vector.broadcast %33 : vector<16x1xf32> to vector<16x128xf32>
    %35 = vector.extract_strided_slice %31 {offsets = [0, 0], sizes = [16, 1], strides = [1, 1]} : vector<16x8xf32> to vector<16x1xf32>
    %36 = vector.extract_strided_slice %30 {offsets = [0, 0], sizes = [1, 128], strides = [1, 1]} : vector<8x128xf32> to vector<1x128xf32>
    %37 = vector.broadcast %35 : vector<16x1xf32> to vector<16x128xf32>
    %38 = vector.broadcast %36 : vector<1x128xf32> to vector<16x128xf32>
    %39 = arith.mulf %37, %38 : vector<16x128xf32>
    %40 = arith.addf %34, %39 : vector<16x128xf32>
    %41 = vector.extract_strided_slice %31 {offsets = [0, 1], sizes = [16, 1], strides = [1, 1]} : vector<16x8xf32> to vector<16x1xf32>
    %42 = vector.extract_strided_slice %30 {offsets = [1, 0], sizes = [1, 128], strides = [1, 1]} : vector<8x128xf32> to vector<1x128xf32>
    %43 = vector.broadcast %41 : vector<16x1xf32> to vector<16x128xf32>
    %44 = vector.broadcast %42 : vector<1x128xf32> to vector<16x128xf32>
    %45 = arith.mulf %43, %44 : vector<16x128xf32>
    %46 = arith.addf %40, %45 : vector<16x128xf32>
    %47 = vector.extract_strided_slice %31 {offsets = [0, 2], sizes = [16, 1], strides = [1, 1]} : vector<16x8xf32> to vector<16x1xf32>
    %48 = vector.extract_strided_slice %30 {offsets = [2, 0], sizes = [1, 128], strides = [1, 1]} : vector<8x128xf32> to vector<1x128xf32>
    %49 = vector.broadcast %47 : vector<16x1xf32> to vector<16x128xf32>
    %50 = vector.broadcast %48 : vector<1x128xf32> to vector<16x128xf32>
    %51 = arith.mulf %49, %50 : vector<16x128xf32>
    %52 = arith.addf %46, %51 : vector<16x128xf32>
    %53 = vector.extract_strided_slice %31 {offsets = [0, 3], sizes = [16, 1], strides = [1, 1]} : vector<16x8xf32> to vector<16x1xf32>
    %54 = vector.extract_strided_slice %30 {offsets = [3, 0], sizes = [1, 128], strides = [1, 1]} : vector<8x128xf32> to vector<1x128xf32>
    %55 = vector.broadcast %53 : vector<16x1xf32> to vector<16x128xf32>
    %56 = vector.broadcast %54 : vector<1x128xf32> to vector<16x128xf32>
    %57 = arith.mulf %55, %56 : vector<16x128xf32>
    %58 = arith.addf %52, %57 : vector<16x128xf32>
    %59 = vector.extract_strided_slice %31 {offsets = [0, 4], sizes = [16, 1], strides = [1, 1]} : vector<16x8xf32> to vector<16x1xf32>
    %60 = vector.extract_strided_slice %30 {offsets = [4, 0], sizes = [1, 128], strides = [1, 1]} : vector<8x128xf32> to vector<1x128xf32>
    %61 = vector.broadcast %59 : vector<16x1xf32> to vector<16x128xf32>
    %62 = vector.broadcast %60 : vector<1x128xf32> to vector<16x128xf32>
    %63 = arith.mulf %61, %62 : vector<16x128xf32>
    %64 = arith.addf %58, %63 : vector<16x128xf32>
    %65 = vector.extract_strided_slice %31 {offsets = [0, 5], sizes = [16, 1], strides = [1, 1]} : vector<16x8xf32> to vector<16x1xf32>
    %66 = vector.extract_strided_slice %30 {offsets = [5, 0], sizes = [1, 128], strides = [1, 1]} : vector<8x128xf32> to vector<1x128xf32>
    %67 = vector.broadcast %65 : vector<16x1xf32> to vector<16x128xf32>
    %68 = vector.broadcast %66 : vector<1x128xf32> to vector<16x128xf32>
    %69 = arith.mulf %67, %68 : vector<16x128xf32>
    %70 = arith.addf %64, %69 : vector<16x128xf32>
    %71 = vector.extract_strided_slice %31 {offsets = [0, 6], sizes = [16, 1], strides = [1, 1]} : vector<16x8xf32> to vector<16x1xf32>
    %72 = vector.extract_strided_slice %30 {offsets = [6, 0], sizes = [1, 128], strides = [1, 1]} : vector<8x128xf32> to vector<1x128xf32>
    %73 = vector.broadcast %71 : vector<16x1xf32> to vector<16x128xf32>
    %74 = vector.broadcast %72 : vector<1x128xf32> to vector<16x128xf32>
    %75 = arith.mulf %73, %74 : vector<16x128xf32>
    %76 = arith.addf %70, %75 : vector<16x128xf32>
    %77 = vector.extract_strided_slice %31 {offsets = [0, 7], sizes = [16, 1], strides = [1, 1]} : vector<16x8xf32> to vector<16x1xf32>
    %78 = vector.extract_strided_slice %30 {offsets = [7, 0], sizes = [1, 128], strides = [1, 1]} : vector<8x128xf32> to vector<1x128xf32>
    %79 = vector.broadcast %77 : vector<16x1xf32> to vector<16x128xf32>
    %80 = vector.broadcast %78 : vector<1x128xf32> to vector<16x128xf32>
    %81 = arith.mulf %79, %80 : vector<16x128xf32>
    %82 = arith.addf %76, %81 : vector<16x128xf32>
    %cst_9 = arith.constant 0.000000e+00 : f32
    %83 = vector.broadcast %cst_9 : f32 to vector<16x128xf32>
    %84 = arith.maximumf %82, %83 : vector<16x128xf32>
    %c0_10 = arith.constant 0 : index
    %c0_11 = arith.constant 0 : index
    %85 = vector.load %arg6[%c0_10, %c0_11] : memref<1x16xf32, #tpu.memory_space<vmem>>, vector<1x16xf32>
    %c0_12 = arith.constant 0 : index
    %c0_13 = arith.constant 0 : index
    %86 = vector.load %arg7[%c0_12, %c0_13] : memref<1x1xf32, #tpu.memory_space<vmem>>, vector<1x1xf32>
    %87 = vector.shape_cast %86 : vector<1x1xf32> to vector<1x1xf32>
    %88 = vector.broadcast %87 : vector<1x1xf32> to vector<1x128xf32>
    %89 = vector.extract_strided_slice %85 {offsets = [0, 0], sizes = [1, 1], strides = [1, 1]} : vector<1x16xf32> to vector<1x1xf32>
    %90 = vector.extract_strided_slice %84 {offsets = [0, 0], sizes = [1, 128], strides = [1, 1]} : vector<16x128xf32> to vector<1x128xf32>
    %91 = vector.broadcast %89 : vector<1x1xf32> to vector<1x128xf32>
    %92 = arith.mulf %91, %90 : vector<1x128xf32>
    %93 = arith.addf %88, %92 : vector<1x128xf32>
    %94 = vector.extract_strided_slice %85 {offsets = [0, 1], sizes = [1, 1], strides = [1, 1]} : vector<1x16xf32> to vector<1x1xf32>
    %95 = vector.extract_strided_slice %84 {offsets = [1, 0], sizes = [1, 128], strides = [1, 1]} : vector<16x128xf32> to vector<1x128xf32>
    %96 = vector.broadcast %94 : vector<1x1xf32> to vector<1x128xf32>
    %97 = arith.mulf %96, %95 : vector<1x128xf32>
    %98 = arith.addf %93, %97 : vector<1x128xf32>
    %99 = vector.extract_strided_slice %85 {offsets = [0, 2], sizes = [1, 1], strides = [1, 1]} : vector<1x16xf32> to vector<1x1xf32>
    %100 = vector.extract_strided_slice %84 {offsets = [2, 0], sizes = [1, 128], strides = [1, 1]} : vector<16x128xf32> to vector<1x128xf32>
    %101 = vector.broadcast %99 : vector<1x1xf32> to vector<1x128xf32>
    %102 = arith.mulf %101, %100 : vector<1x128xf32>
    %103 = arith.addf %98, %102 : vector<1x128xf32>
    %104 = vector.extract_strided_slice %85 {offsets = [0, 3], sizes = [1, 1], strides = [1, 1]} : vector<1x16xf32> to vector<1x1xf32>
    %105 = vector.extract_strided_slice %84 {offsets = [3, 0], sizes = [1, 128], strides = [1, 1]} : vector<16x128xf32> to vector<1x128xf32>
    %106 = vector.broadcast %104 : vector<1x1xf32> to vector<1x128xf32>
    %107 = arith.mulf %106, %105 : vector<1x128xf32>
    %108 = arith.addf %103, %107 : vector<1x128xf32>
    %109 = vector.extract_strided_slice %85 {offsets = [0, 4], sizes = [1, 1], strides = [1, 1]} : vector<1x16xf32> to vector<1x1xf32>
    %110 = vector.extract_strided_slice %84 {offsets = [4, 0], sizes = [1, 128], strides = [1, 1]} : vector<16x128xf32> to vector<1x128xf32>
    %111 = vector.broadcast %109 : vector<1x1xf32> to vector<1x128xf32>
    %112 = arith.mulf %111, %110 : vector<1x128xf32>
    %113 = arith.addf %108, %112 : vector<1x128xf32>
    %114 = vector.extract_strided_slice %85 {offsets = [0, 5], sizes = [1, 1], strides = [1, 1]} : vector<1x16xf32> to vector<1x1xf32>
    %115 = vector.extract_strided_slice %84 {offsets = [5, 0], sizes = [1, 128], strides = [1, 1]} : vector<16x128xf32> to vector<1x128xf32>
    %116 = vector.broadcast %114 : vector<1x1xf32> to vector<1x128xf32>
    %117 = arith.mulf %116, %115 : vector<1x128xf32>
    %118 = arith.addf %113, %117 : vector<1x128xf32>
    %119 = vector.extract_strided_slice %85 {offsets = [0, 6], sizes = [1, 1], strides = [1, 1]} : vector<1x16xf32> to vector<1x1xf32>
    %120 = vector.extract_strided_slice %84 {offsets = [6, 0], sizes = [1, 128], strides = [1, 1]} : vector<16x128xf32> to vector<1x128xf32>
    %121 = vector.broadcast %119 : vector<1x1xf32> to vector<1x128xf32>
    %122 = arith.mulf %121, %120 : vector<1x128xf32>
    %123 = arith.addf %118, %122 : vector<1x128xf32>
    %124 = vector.extract_strided_slice %85 {offsets = [0, 7], sizes = [1, 1], strides = [1, 1]} : vector<1x16xf32> to vector<1x1xf32>
    %125 = vector.extract_strided_slice %84 {offsets = [7, 0], sizes = [1, 128], strides = [1, 1]} : vector<16x128xf32> to vector<1x128xf32>
    %126 = vector.broadcast %124 : vector<1x1xf32> to vector<1x128xf32>
    %127 = arith.mulf %126, %125 : vector<1x128xf32>
    %128 = arith.addf %123, %127 : vector<1x128xf32>
    %129 = vector.extract_strided_slice %85 {offsets = [0, 8], sizes = [1, 1], strides = [1, 1]} : vector<1x16xf32> to vector<1x1xf32>
    %130 = vector.extract_strided_slice %84 {offsets = [8, 0], sizes = [1, 128], strides = [1, 1]} : vector<16x128xf32> to vector<1x128xf32>
    %131 = vector.broadcast %129 : vector<1x1xf32> to vector<1x128xf32>
    %132 = arith.mulf %131, %130 : vector<1x128xf32>
    %133 = arith.addf %128, %132 : vector<1x128xf32>
    %134 = vector.extract_strided_slice %85 {offsets = [0, 9], sizes = [1, 1], strides = [1, 1]} : vector<1x16xf32> to vector<1x1xf32>
    %135 = vector.extract_strided_slice %84 {offsets = [9, 0], sizes = [1, 128], strides = [1, 1]} : vector<16x128xf32> to vector<1x128xf32>
    %136 = vector.broadcast %134 : vector<1x1xf32> to vector<1x128xf32>
    %137 = arith.mulf %136, %135 : vector<1x128xf32>
    %138 = arith.addf %133, %137 : vector<1x128xf32>
    %139 = vector.extract_strided_slice %85 {offsets = [0, 10], sizes = [1, 1], strides = [1, 1]} : vector<1x16xf32> to vector<1x1xf32>
    %140 = vector.extract_strided_slice %84 {offsets = [10, 0], sizes = [1, 128], strides = [1, 1]} : vector<16x128xf32> to vector<1x128xf32>
    %141 = vector.broadcast %139 : vector<1x1xf32> to vector<1x128xf32>
    %142 = arith.mulf %141, %140 : vector<1x128xf32>
    %143 = arith.addf %138, %142 : vector<1x128xf32>
    %144 = vector.extract_strided_slice %85 {offsets = [0, 11], sizes = [1, 1], strides = [1, 1]} : vector<1x16xf32> to vector<1x1xf32>
    %145 = vector.extract_strided_slice %84 {offsets = [11, 0], sizes = [1, 128], strides = [1, 1]} : vector<16x128xf32> to vector<1x128xf32>
    %146 = vector.broadcast %144 : vector<1x1xf32> to vector<1x128xf32>
    %147 = arith.mulf %146, %145 : vector<1x128xf32>
    %148 = arith.addf %143, %147 : vector<1x128xf32>
    %149 = vector.extract_strided_slice %85 {offsets = [0, 12], sizes = [1, 1], strides = [1, 1]} : vector<1x16xf32> to vector<1x1xf32>
    %150 = vector.extract_strided_slice %84 {offsets = [12, 0], sizes = [1, 128], strides = [1, 1]} : vector<16x128xf32> to vector<1x128xf32>
    %151 = vector.broadcast %149 : vector<1x1xf32> to vector<1x128xf32>
    %152 = arith.mulf %151, %150 : vector<1x128xf32>
    %153 = arith.addf %148, %152 : vector<1x128xf32>
    %154 = vector.extract_strided_slice %85 {offsets = [0, 13], sizes = [1, 1], strides = [1, 1]} : vector<1x16xf32> to vector<1x1xf32>
    %155 = vector.extract_strided_slice %84 {offsets = [13, 0], sizes = [1, 128], strides = [1, 1]} : vector<16x128xf32> to vector<1x128xf32>
    %156 = vector.broadcast %154 : vector<1x1xf32> to vector<1x128xf32>
    %157 = arith.mulf %156, %155 : vector<1x128xf32>
    %158 = arith.addf %153, %157 : vector<1x128xf32>
    %159 = vector.extract_strided_slice %85 {offsets = [0, 14], sizes = [1, 1], strides = [1, 1]} : vector<1x16xf32> to vector<1x1xf32>
    %160 = vector.extract_strided_slice %84 {offsets = [14, 0], sizes = [1, 128], strides = [1, 1]} : vector<16x128xf32> to vector<1x128xf32>
    %161 = vector.broadcast %159 : vector<1x1xf32> to vector<1x128xf32>
    %162 = arith.mulf %161, %160 : vector<1x128xf32>
    %163 = arith.addf %158, %162 : vector<1x128xf32>
    %164 = vector.extract_strided_slice %85 {offsets = [0, 15], sizes = [1, 1], strides = [1, 1]} : vector<1x16xf32> to vector<1x1xf32>
    %165 = vector.extract_strided_slice %84 {offsets = [15, 0], sizes = [1, 128], strides = [1, 1]} : vector<16x128xf32> to vector<1x128xf32>
    %166 = vector.broadcast %164 : vector<1x1xf32> to vector<1x128xf32>
    %167 = arith.mulf %166, %165 : vector<1x128xf32>
    %168 = arith.addf %163, %167 : vector<1x128xf32>
    %cst_14 = arith.constant 0.000000e+00 : f32
    %169 = vector.broadcast %cst_14 : f32 to vector<1x128xf32>
    %170 = arith.subf %169, %168 : vector<1x128xf32>
    %171 = math.exp %170 : vector<1x128xf32>
    %cst_15 = arith.constant 1.000000e+00 : f32
    %172 = vector.broadcast %cst_15 : f32 to vector<1x128xf32>
    %173 = arith.addf %172, %171 : vector<1x128xf32>
    %174 = tpu.reciprocal %173 : vector<1x128xf32> -> vector<1x128xf32>
    %c0_16 = arith.constant 0 : index
    %c0_17 = arith.constant 0 : index
    %175 = vector.load %arg8[%c0_16, %c0_17] : memref<1x128xf32, #tpu.memory_space<vmem>>, vector<1x128xf32>
    tpu.vector_store %arg8[%c0_16, %c0_17], %174 {strides = array<i32>} : memref<1x128xf32, #tpu.memory_space<vmem>>, vector<1x128xf32>,
    return
  }
  func.func @transform_0(%arg0: i32) -> (i32, i32) {
    %c0_i32 = arith.constant 0 : i32
    %c0_i32_0 = arith.constant 0 : i32
    return %c0_i32, %arg0 : i32, i32
  }
  func.func @transform_1(%arg0: i32) -> (i32, i32) {
    %c0_i32 = arith.constant 0 : i32
    %c0_i32_0 = arith.constant 0 : i32
    %c0_i32_1 = arith.constant 0 : i32
    return %c0_i32, %c0_i32_0 : i32, i32
  }
  func.func @transform_2(%arg0: i32) -> (i32, i32) {
    %c0_i32 = arith.constant 0 : i32
    %c0_i32_0 = arith.constant 0 : i32
    %c0_i32_1 = arith.constant 0 : i32
    return %c0_i32, %c0_i32_0 : i32, i32
  }
  func.func @transform_3(%arg0: i32) -> (i32, i32) {
    %c0_i32 = arith.constant 0 : i32
    %c0_i32_0 = arith.constant 0 : i32
    %c0_i32_1 = arith.constant 0 : i32
    return %c0_i32, %c0_i32_0 : i32, i32
  }
  func.func @transform_4(%arg0: i32) -> (i32, i32) {
    %c0_i32 = arith.constant 0 : i32
    %c0_i32_0 = arith.constant 0 : i32
    %c0_i32_1 = arith.constant 0 : i32
    return %c0_i32, %c0_i32_0 : i32, i32
  }
  func.func @transform_5(%arg0: i32) -> (i32, i32) {
    %c0_i32 = arith.constant 0 : i32
    %c0_i32_0 = arith.constant 0 : i32
    %c0_i32_1 = arith.constant 0 : i32
    return %c0_i32, %c0_i32_0 : i32, i32
  }
  func.func @transform_6(%arg0: i32) -> (i32, i32) {
    %c0_i32 = arith.constant 0 : i32
    %c0_i32_0 = arith.constant 0 : i32
    %c0_i32_1 = arith.constant 0 : i32
    return %c0_i32, %c0_i32_0 : i32, i32
  }
  func.func @transform_7(%arg0: i32) -> (i32, i32) {
    %c0_i32 = arith.constant 0 : i32
    %c0_i32_0 = arith.constant 0 : i32
    return %c0_i32, %arg0 : i32, i32
  }
}

</mosaic_0001>

<bundles_post_ra>
// kernel: tpu_custom_call.1
= control target key start
LH: loop header
LB: loop body
LE: loop exit
PB: predicated region body
PF: predicated region fallthrough
CT: control target
= control target key end

     0   :  { %s665_s0 = inlined_call_operand.vmem [shape: f32[4,128], index: 0, kind: input, shape index: {}]   ;;  %s666_s1 = inlined_call_operand.vmem [shape: f32[8,4], index: 1, kind: input, shape index: {}]   ;;  %s667_s2 = inlined_call_operand.vmem [shape: f32[8,1], index: 2, kind: input, shape index: {}]   ;;  %s668_s3 = inlined_call_operand.vmem [shape: f32[16,8], index: 3, kind: input, shape index: {}]   ;;  %s669_s4 = inlined_call_operand.vmem [shape: f32[16,1], index: 4, kind: input, shape index: {}]   ;;  %s670_s5 = inlined_call_operand.vmem [shape: f32[1,16], index: 5, kind: input, shape index: {}]   ;;  %s671_s6 = inlined_call_operand.<no memory space> [shape: f32[1,1], index: 6, kind: input, shape index: {}]   ;;  %s672_s7 = inlined_call_operand.hbm [shape: f32[1,128], index: 7, kind: output, shape index: {}]  }
   0x1   :  { %v12_v0 = vstv %s671_s6 }
   0x2   :  { %13 = vst [vmem:[#allocation2] sm:$0x1] %v12_v0 }
   0x3   :  { %v30_v1 = vld [vmem:[%s666_s1] sm:$0xff]  ;;  %v538_v2 = vmov 1   ;;  %v539_v3 = vmov 0  }
   0x4   :  { %477 = vset.pattern.permute.xlu1 %v538_v2  ;;  %476 = vset.pattern.permute.xlu0 %v539_v3  ;;  %v31_v4 = vld [vmem:[%s667_s2] sm:$0xff] }
   0x5   :  { %49 = vperm.xlu1 %477, %v30_v1   ;;  %39 = vperm.xlu0 %476, %v30_v1  }
   0x6   :  { %14 = vsyncpa [#allocation4], 0  ;;  %v540_v5 = vmov 2   ;;  %v79_v6 = vld [vmem:[%s668_s3] sm:$0xff]  ;;  %v541_v7 = vmov 3   ;;  %v542_v9 = vmov 7   ;;  %v42_v26 = vlaneseq }
   0x7   :  { %v81_v8 = vld [vmem:[%s669_s4] sm:$0xff]  ;;  %v80_v10 = vld [vmem:[%s668_s3 + $0x8] sm:$0xff]  ;;  %v543_v11 = vmov 5   ;;  %v544_v12 = vmov 6   ;;  %v545_v13 = vmov 4   ;;  %v546_v17 = vmov 10  }
   0x8   :  { %v225_v14 = vld [vmem:[%s670_s5] sm:$0x1]  ;;  %v82_v15 = vld [vmem:[%s669_s4 + $0x8] sm:$0xff]  ;;  %v547_v18 = vmov 13   ;;  %v548_v19 = vmov 15   ;;  %v549_v20 = vmov 8  }
   0x9   :  { %478 = vset.pattern.permute.xlu1 %v540_v5  ;;  %34 = vperm.xlu0 %476, %v31_v4   ;;  %v226_v16 = vld [vmem:[#allocation2] sm:$0x1]  ;;  %v550_v21 = vmov 9   ;;  %v551_v22 = vmov 11   ;;  %v552_v23 = vmov 12   ;;  %v553_v24 = vmov 14  }
   0xa   :  { %59 = vperm.xlu1 %478, %v30_v1   ;;  %v619_v28 = vshrl.u32 %v42_v26, 7  ;;  %v29_v32 = vld [vmem:[%s665_s0] sm:$0xf]  ;;  %s554_s0 = smov [#allocation3]  }
   0xb   :  { %s451_s13 = sshll.u32 %s554_s0, 4  ;;  %s452_s13 = int_to_ptr.vmem [resolvable:$true] %s451_s13 }
   0xc   :  { %v622_v29 = vsub.s32 0, %v619_v28  ;;  %v54_v34 = vsub.s32 1, %v619_v28  ;;  %v64_v38 = vsub.s32 2, %v619_v28  ;;  %v74_v43 = vsub.s32 3, %v619_v28  ;;  %s514_s14 = scalar_lea.vmem %s452_s13, 16  ;;  %s518_s15 = scalar_lea.vmem %s452_s13, 32 }
   0xd   :  { %479 = vset.pattern.permute.xlu0 %v541_v7  ;;  %p515_p0 = scmp.ne.s32.totalorder %s452_s13, %s514_s14  ;;  %p519_p1 = scmp.lt.s32.totalorder %s452_s13, %s452_s13 }
   0xe   :  { %480 = vset.pattern.permute.xlu1 %v539_v3  ;;  %69 = vperm.xlu0 %479, %v30_v1   ;;  %v45_v33 = vrot.slane %v29_v32, %v622_v29  ;;  %v55_v39 = vrot.slane %v29_v32, %v54_v34  ;;  %v65_v42 = vrot.slane %v29_v32, %v64_v38  ;;  %p520_p2 = scmp.lt.s32.totalorder %s518_s15, %s514_s14 }
   0xf   :  { %95 = vperm.xlu1 %480, %v79_v6   ;;  %v75_v48 = vrot.slane %v29_v32, %v74_v43 }
  0x10   :  { %p521_p3 = por %p520_p2, %p519_p1 }
  0x12   :  { %485 = vset.pattern.permute.xlu0 %v542_v9  ;;  %p522_p4 = pnand %p521_p3, %p515_p0 }
  0x13   :  { %85 = vperm.xlu1 %480, %v81_v8   ;;  %208 = vperm.xlu0 %485, %v79_v6  }
  0x17   :  { %481 = vset.pattern.permute.xlu1 %v540_v5  ;;  %486 = vset.pattern.permute.xlu0 %v538_v2 }
  0x18   :  { %128 = vperm.xlu1 %481, %v79_v6   ;;  %112 = vperm.xlu0 %486, %v79_v6  }
  0x1c   :  { %482 = vset.pattern.permute.xlu1 %v541_v7  ;;  %116 = vperm.xlu0 %486, %v80_v10  }
  0x1d   :  { %144 = vperm.xlu1 %482, %v79_v6  }
  0x20   :  { %489 = vset.pattern.permute.xlu0 %v540_v5 }
  0x21   :  { %483 = vset.pattern.permute.xlu1 %v543_v11  ;;  %132 = vperm.xlu0 %489, %v80_v10  }
  0x22   :  { %176 = vperm.xlu1 %483, %v79_v6  }
  0x25   :  { %492 = vset.pattern.permute.xlu0 %v541_v7 }
  0x26   :  { %484 = vset.pattern.permute.xlu1 %v544_v12  ;;  %148 = vperm.xlu0 %492, %v80_v10  }
  0x27   :  { %192 = vperm.xlu1 %484, %v79_v6  }
  0x2a   :  { %493 = vset.pattern.permute.xlu0 %v545_v13 }
  0x2b   :  { %487 = vset.pattern.permute.xlu1 %v539_v3  ;;  %160 = vperm.xlu0 %493, %v79_v6  }
  0x2c   :  { %100 = vperm.xlu1 %487, %v80_v10  }
  0x2f   :  { %287 = vperm.xlu0 %493, %v225_v14  }
  0x30   :  { %90 = vperm.xlu1 %487, %v82_v15  }
  0x33   :  { %497 = vset.pattern.permute.xlu0 %v544_v12 }
  0x34   :  { %238 = vperm.xlu1 %487, %v225_v14   ;;  %196 = vperm.xlu0 %497, %v80_v10  }
  0x38   :  { %488 = vset.pattern.permute.xlu1 %v538_v2  ;;  %500 = vset.pattern.permute.xlu0 %v542_v9 }
  0x39   :  { %248 = vperm.xlu1 %488, %v225_v14   ;;  %326 = vperm.xlu0 %500, %v225_v14  }
  0x3d   :  { %490 = vset.pattern.permute.xlu1 %v539_v3  ;;  %503 = vset.pattern.permute.xlu0 %v546_v17 }
  0x3e   :  { %229 = vperm.xlu1 %490, %v226_v16   ;;  %362 = vperm.xlu0 %503, %v225_v14   ;;  %v185_v16 = vsub.s32 5, %v619_v28 }
  0x42   :  { %491 = vset.pattern.permute.xlu1 %v540_v5  ;;  %506 = vset.pattern.permute.xlu0 %v547_v18 }
  0x43   :  { %261 = vperm.xlu1 %491, %v225_v14   ;;  %401 = vperm.xlu0 %506, %v225_v14  }
  0x47   :  { %494 = vset.pattern.permute.xlu1 %v541_v7  ;;  %509 = vset.pattern.permute.xlu0 %v548_v19  ;;  %v169_v7 = vsub.s32 4, %v619_v28 }
  0x48   :  { %274 = vperm.xlu1 %494, %v225_v14  }
  0x4c   :  { %495 = vset.pattern.permute.xlu1 %v545_v13 }
  0x4d   :  { %164 = vperm.xlu1 %495, %v80_v10  }
  0x51   :  { %496 = vset.pattern.permute.xlu1 %v543_v11 }
  0x52   :  { %180 = vperm.xlu1 %496, %v80_v10  }
  0x56   :  { %300 = vperm.xlu1 %496, %v225_v14  }
  0x5a   :  { %498 = vset.pattern.permute.xlu1 %v544_v12 }
  0x5b   :  { %313 = vperm.xlu1 %498, %v225_v14  }
  0x5f   :  { %499 = vset.pattern.permute.xlu1 %v542_v9 }
  0x60   :  { %212 = vperm.xlu1 %499, %v80_v10  }
  0x64   :  { %501 = vset.pattern.permute.xlu1 %v549_v20  ;;  %v201_v20 = vsub.s32 6, %v619_v28 }
  0x65   :  { %339 = vperm.xlu1 %501, %v225_v14  }
  0x69   :  { %502 = vset.pattern.permute.xlu1 %v550_v21 }
  0x6a   :  { %349 = vperm.xlu1 %502, %v225_v14  }
  0x6e   :  { %504 = vset.pattern.permute.xlu1 %v551_v22 }
  0x6f   :  { %375 = vperm.xlu1 %504, %v225_v14  }
  0x73   :  { %505 = vset.pattern.permute.xlu1 %v552_v23  ;;  %v217_v23 = vsub.s32 7, %v619_v28 }
  0x74   :  { %388 = vperm.xlu1 %505, %v225_v14  }
  0x78   :  { %507 = vset.pattern.permute.xlu1 %v553_v24 }
  0x79   :  { %414 = vperm.xlu1 %507, %v225_v14  }
  0x7d   :  { %508 = vset.pattern.permute.xlu1 %v548_v19 }
  0x7e   :  { %427 = vperm.xlu1 %508, %v225_v14  }
  0x84   :  { %v50_v25 = vpop.permute.xlu1 %49  ;;  %v40_v30 = vpop.permute.xlu0 %39 }
  0x85   :  { %v46_v37 = vmul.f32 %v45_v33, %v40_v30  ;;  %v56_v45 = vmul.f32 %v55_v39, %v50_v25 }
  0x88   :  { %v35_v36 = vpop.permute.xlu0 %34 }
  0x89   :  { %v60_v27 = vpop.permute.xlu1 %59  ;;  %v47_v41 = vadd.f32 %v46_v37, %v35_v36 }
  0x8a   :  { %v66_v47 = vmul.f32 %v65_v42, %v60_v27 }
  0x8b   :  { %v57_v46 = vadd.f32 %v56_v45, %v47_v41 }
  0x8d   :  { %v70_v44 = vpop.permute.xlu0 %69  ;;  %v67_v51 = vadd.f32 %v66_v47, %v57_v46 }
  0x8e   :  { %v96_v31 = vpop.permute.xlu1 %95  ;;  %v76_v52 = vmul.f32 %v75_v48, %v70_v44 }
  0x90   :  { %v77_v55 = vadd.f32 %v76_v52, %v67_v51 }
  0x92   :  { %v86_v35 = vpop.permute.xlu1 %85  ;;  %v209_v50 = vpop.permute.xlu0 %208  ;;  %v78_v57 = vmax.f32 %v77_v55, 0.0 }
  0x94   :  { %v106_v60 = vrot.slane %v78_v57, %v622_v29  ;;  %v122_v0 = vrot.slane %v78_v57, %v54_v34  ;;  %v138_v5 = vrot.slane %v78_v57, %v64_v38  ;;  %v154_v10 = vrot.slane %v78_v57, %v74_v43 }
  0x95   :  { %v170_v14 = vrot.slane %v78_v57, %v169_v7  ;;  %v186_v19 = vrot.slane %v78_v57, %v185_v16  ;;  %v202_v25 = vrot.slane %v78_v57, %v201_v20  ;;  %v218_v30 = vrot.slane %v78_v57, %v217_v23 }
  0x96   :  { %v107_v63 = vmul.f32 %v106_v60, %v96_v31 }
  0x97   :  { %v129_v40 = vpop.permute.xlu1 %128  ;;  %v113_v54 = vpop.permute.xlu0 %112  ;;  %v219_v34 = vmul.f32 %v218_v30, %v209_v50 }
  0x98   :  { %v109_v2 = vadd.f32 %v107_v63, %v86_v35  ;;  %v123_v3 = vmul.f32 %v122_v0, %v113_v54  ;;  %v139_v9 = vmul.f32 %v138_v5, %v129_v40 }
  0x9a   :  { %v125_v6 = vadd.f32 %v123_v3, %v109_v2 }
  0x9b   :  { %v117_v58 = vpop.permute.xlu0 %116 }
  0x9c   :  { %v145_v49 = vpop.permute.xlu1 %144  ;;  %v141_v12 = vadd.f32 %v139_v9, %v125_v6  ;;  %v124_v37 = vmul.f32 %v122_v0, %v117_v58 }
  0x9d   :  { %v155_v13 = vmul.f32 %v154_v10, %v145_v49 }
  0x9f   :  { %v157_v18 = vadd.f32 %v155_v13, %v141_v12 }
  0xa0   :  { %v133_v61 = vpop.permute.xlu0 %132 }
  0xa1   :  { %v177_v53 = vpop.permute.xlu1 %176  ;;  %v140_v40 = vmul.f32 %v138_v5, %v133_v61 }
  0xa2   :  { %v187_v24 = vmul.f32 %v186_v19, %v177_v53 }
  0xa5   :  { %v149_v4 = vpop.permute.xlu0 %148 }
  0xa6   :  { %v193_v56 = vpop.permute.xlu1 %192  ;;  %v156_v49 = vmul.f32 %v154_v10, %v149_v4 }
  0xa7   :  { %v203_v31 = vmul.f32 %v202_v25, %v193_v56 }
  0xaa   :  { %v161_v11 = vpop.permute.xlu0 %160 }
  0xab   :  { %v101_v59 = vpop.permute.xlu1 %100  ;;  %v171_v17 = vmul.f32 %v170_v14, %v161_v11 }
  0xac   :  { %v108_v33 = vmul.f32 %v106_v60, %v101_v59 }
  0xad   :  { %v173_v21 = vadd.f32 %v171_v17, %v157_v18 }
  0xae   :  { %v288_v45 = vpop.permute.xlu0 %287 }
  0xaf   :  { %v91_v62 = vpop.permute.xlu1 %90  ;;  %v189_v26 = vadd.f32 %v187_v24, %v173_v21  ;;  %v293_v59 = vrot.slane %v288_v45, %v622_v29 }
  0xb0   :  { %v110_v35 = vadd.f32 %v108_v33, %v91_v62 }
  0xb1   :  { %v205_v32 = vadd.f32 %v203_v31, %v189_v26 }
  0xb2   :  { %v126_v39 = vadd.f32 %v124_v37, %v110_v35 }
  0xb3   :  { %v239_v1 = vpop.permute.xlu1 %238  ;;  %v221_v38 = vadd.f32 %v219_v34, %v205_v32  ;;  %v197_v60 = vpop.permute.xlu0 %196 }
  0xb4   :  { %v244_v43 = vrot.slane %v239_v1, %v622_v29  ;;  %v142_v46 = vadd.f32 %v140_v40, %v126_v39  ;;  %v204_v7 = vmul.f32 %v202_v25, %v197_v60 }
  0xb5   :  { %v223_v42 = vmax.f32 %v221_v38, 0.0 }
  0xb6   :  { %v158_v57 = vadd.f32 %v156_v49, %v142_v46 }
  0xb7   :  { %v245_v51 = vmul.f32 %v244_v43, %v223_v42  ;;  %v294_v6 = vmul.f32 %v293_v59, %v223_v42 }
  0xb8   :  { %v249_v8 = vpop.permute.xlu1 %248  ;;  %v327_v10 = vpop.permute.xlu0 %326 }
  0xb9   :  { %v254_v28 = vrot.slane %v249_v8, %v622_v29  ;;  %v296_v16 = vrot.slane %v294_v6, 4  ;;  %v332_v17 = vrot.slane %v327_v10, %v622_v29 }
  0xbb   :  { %v255_v52 = vmul.f32 %v254_v28, %v223_v42  ;;  %v333_v23 = vmul.f32 %v332_v17, %v223_v42 }
  0xbd   :  { %v230_v15 = vpop.permute.xlu1 %229  ;;  %v257_v61 = vrot.slane %v255_v52, 1  ;;  %v363_v31 = vpop.permute.xlu0 %362  ;;  %v335_v33 = vrot.slane %v333_v23, 7 }
  0xbe   :  { %v235_v47 = vrot.slane %v230_v15, %v622_v29  ;;  %v368_v34 = vrot.slane %v363_v31, %v622_v29 }
  0xc0   :  { %v246_v55 = vadd.f32 %v245_v51, %v235_v47 }
  0xc2   :  { %v262_v22 = vpop.permute.xlu1 %261  ;;  %v259_v2 = vadd.f32 %v257_v61, %v246_v55  ;;  %v402_v28 = vpop.permute.xlu0 %401 }
  0xc3   :  { %v267_v44 = vrot.slane %v262_v22, %v622_v29  ;;  %v407_v47 = vrot.slane %v402_v28, %v622_v29 }
  0xc5   :  { %v268_v53 = vmul.f32 %v267_v44, %v223_v42 }
  0xc7   :  { %v275_v27 = vpop.permute.xlu1 %274  ;;  %v270_v62 = vrot.slane %v268_v53, 2 }
  0xc8   :  { %v280_v48 = vrot.slane %v275_v27, %v622_v29 }
  0xc9   :  { %v272_v8 = vadd.f32 %v270_v62, %v259_v2 }
  0xca   :  { %v281_v56 = vmul.f32 %v280_v48, %v223_v42 }
  0xcc   :  { %v165_v36 = vpop.permute.xlu1 %164  ;;  %v283_v3 = vrot.slane %v281_v56, 3 }
  0xcd   :  { %v172_v54 = vmul.f32 %v170_v14, %v165_v36 }
  0xce   :  { %v285_v12 = vadd.f32 %v283_v3, %v272_v8 }
  0xcf   :  { %v174_v63 = vadd.f32 %v172_v54, %v158_v57 }
  0xd0   :  { %v298_v20 = vadd.f32 %v296_v16, %v285_v12 }
  0xd1   :  { %v181_v41 = vpop.permute.xlu1 %180 }
  0xd2   :  { %v188_v58 = vmul.f32 %v186_v19, %v181_v41 }
  0xd4   :  { %v190_v4 = vadd.f32 %v188_v58, %v174_v63 }
  0xd5   :  { %v301_v50 = vpop.permute.xlu1 %300 }
  0xd6   :  { %v306_v0 = vrot.slane %v301_v50, %v622_v29  ;;  %v206_v14 = vadd.f32 %v204_v7, %v190_v4 }
  0xd8   :  { %v307_v9 = vmul.f32 %v306_v0, %v223_v42 }
  0xda   :  { %v314_v1 = vpop.permute.xlu1 %313  ;;  %v309_v18 = vrot.slane %v307_v9, 5 }
  0xdb   :  { %v319_v5 = vrot.slane %v314_v1, %v622_v29 }
  0xdc   :  { %v311_v24 = vadd.f32 %v309_v18, %v298_v20 }
  0xdd   :  { %v320_v13 = vmul.f32 %v319_v5, %v223_v42 }
  0xdf   :  { %v213_v11 = vpop.permute.xlu1 %212  ;;  %v322_v21 = vrot.slane %v320_v13, 6 }
  0xe0   :  { %v220_v15 = vmul.f32 %v218_v30, %v213_v11 }
  0xe1   :  { %v324_v27 = vadd.f32 %v322_v21, %v311_v24 }
  0xe2   :  { %v222_v19 = vadd.f32 %v220_v15, %v206_v14 }
  0xe3   :  { %v337_v36 = vadd.f32 %v335_v33, %v324_v27 }
  0xe4   :  { %v340_v22 = vpop.permute.xlu1 %339  ;;  %v224_v26 = vmax.f32 %v222_v19, 0.0 }
  0xe5   :  { %v345_v25 = vrot.slane %v340_v22, %v622_v29 }
  0xe6   :  { %v369_v38 = vmul.f32 %v368_v34, %v224_v26  ;;  %v408_v52 = vmul.f32 %v407_v47, %v224_v26 }
  0xe7   :  { %v346_v30 = vmul.f32 %v345_v25, %v224_v26 }
  0xe8   :  { %v371_v45 = vrot.slane %v369_v38, 2  ;;  %v410_v59 = vrot.slane %v408_v52, 5 }
  0xe9   :  { %v350_v32 = vpop.permute.xlu1 %349  ;;  %v347_v39 = vadd.f32 %v346_v30, %v337_v36 }
  0xea   :  { %v355_v35 = vrot.slane %v350_v32, %v622_v29 }
  0xec   :  { %v356_v37 = vmul.f32 %v355_v35, %v224_v26 }
  0xee   :  { %v358_v40 = vrot.slane %v356_v37, 1  ;;  %v376_v41 = vpop.permute.xlu1 %375 }
  0xef   :  { %v381_v42 = vrot.slane %v376_v41, %v622_v29 }
  0xf0   :  { %v360_v43 = vadd.f32 %v358_v40, %v347_v39 }
  0xf1   :  { %v382_v44 = vmul.f32 %v381_v42, %v224_v26 }
  0xf2   :  { %v373_v48 = vadd.f32 %v371_v45, %v360_v43 }
  0xf3   :  { %v389_v46 = vpop.permute.xlu1 %388  ;;  %v384_v49 = vrot.slane %v382_v44, 3 }
  0xf4   :  { %v394_v50 = vrot.slane %v389_v46, %v622_v29 }
  0xf5   :  { %v386_v53 = vadd.f32 %v384_v49, %v373_v48 }
  0xf6   :  { %v395_v51 = vmul.f32 %v394_v50, %v224_v26 }
  0xf8   :  { %v397_v54 = vrot.slane %v395_v51, 4  ;;  %v415_v55 = vpop.permute.xlu1 %414 }
  0xf9   :  { %v420_v56 = vrot.slane %v415_v55, %v622_v29 }
  0xfa   :  { %v399_v57 = vadd.f32 %v397_v54, %v386_v53 }
  0xfb   :  { %v421_v58 = vmul.f32 %v420_v56, %v224_v26 }
  0xfc   :  { %v412_v61 = vadd.f32 %v410_v59, %v399_v57 }
  0xfd   :  { %v428_v60 = vpop.permute.xlu1 %427  ;;  %v423_v62 = vrot.slane %v421_v58, 6 }
  0xfe   :  { %v433_v63 = vrot.slane %v428_v60, %v622_v29 }
  0xff   :  { %v425_v1 = vadd.f32 %v423_v62, %v412_v61 }
 0x100   :  { %v434_v0 = vmul.f32 %v433_v63, %v224_v26 }
 0x102   :  { %v436_v2 = vrot.slane %v434_v0, 7 }
 0x104   :  { %v438_v3 = vadd.f32 %v436_v2, %v425_v1 }
 0x106   :  { %v439_v4 = vsub.f32 0.0, %v438_v3 }
 0x108   :  { %v440_v5 = vmul.f32 1.442695, %v439_v4 }
 0x10a   :  { %510 = vpow2.f32 %v440_v5 }
 0x114   :  { %v511_v6 = vpop.eup %510 }
 0x115   :  { %v442_v7 = vadd.f32 1.0, %v511_v6 }
 0x117   :  { %512 = vrcp.f32 %v442_v7 }
 0x121   :  { %v513_v8 = vpop.eup %512 }
 0x122   :  { %444 = vst [vmem:[#allocation3] sm:$0x1] %v513_v8 }
 0x123   :  { %525 = shalt.err (!%p522_p4)
}
 0x124   :  { %s526_s18 = scalar_lea.hbm %s672_s7, 16 }
 0x125   :  { %p527_p5 = scmp.ne.s32.totalorder %s672_s7, %s526_s18  ;;  %p530_p6 = scmp.lt.u32.totalorder %s526_s18, %s672_s7 }
 0x127   :  { %p532_p7 = pnand %p530_p6, %p527_p5 }
 0x129   :  { %535 = shalt.err (!%p532_p7)
}
 0x12a   :  { %454 = dma.vmem_to_hbm [thread:$0]  %s452_s13, 16, %s672_s7, [#allocation4]  }
 0x12b   :  { %536 = dma.done.wait [#allocation4], 16  }
 0x12c   :  { %537 = vsyncadd [#allocation4], 4294967280 }
 0x12d   :  { %458 = vsyncpa [#allocation4], 1 }

</bundles_post_ra>
